<compile_context>
chip_gen: v7x
topology: tpu7x:2x2x1
jax: 0.10.0
libtpu: 0.0.40
codegen_flags: <defaults>
</compile_context>

<pallas_src>
import functools

import jax
import jax.numpy as jnp
from jax.experimental import pallas as pl
from jax.experimental.pallas import tpu as pltpu

NEG_INF = -1e30  # finite "minus infinity" so masked lanes never produce NaN


def _round_up(x, m):
    return (x + m - 1) // m * m


def _vmem_capacity_bytes():
    """Per-core VMEM capacity; conservative 64 MiB (v7x) fallback if unqueryable."""
    try:
        return int(pltpu.get_tpu_info().vmem_capacity_bytes)
    except Exception:
        return 64 * 2 ** 20


def _scalar_tile(shape, value):
    """f32 tile of `shape` with `value` at [0, 0] and zeros elsewhere (lane-dense)."""
    r = jax.lax.broadcasted_iota(jnp.int32, shape, 0)
    c = jax.lax.broadcasted_iota(jnp.int32, shape, 1)
    return jnp.where((r == 0) & (c == 0), value, 0.0)


def _ce_rows(logits, lbl, col, mask_rows):
    """Per-row cross entropy = logsumexp(row) - picked logit.

    Avoids materializing the full [tb, NP] log-softmax and the one-hot multiply.
    Padded rows carry label -1 and are zeroed when mask_rows is True.
    """
    m = jnp.max(logits, axis=-1, keepdims=True)
    lse = m + jnp.log(jnp.sum(jnp.exp(logits - m), axis=-1, keepdims=True))
    picked = jnp.sum(jnp.where(col == lbl, logits, 0.0), axis=-1, keepdims=True)
    ce = lse - picked
    if mask_rows:
        ce = jnp.where(lbl >= 0, ce, 0.0)
    return ce


def _base_only_kernel(lbl_ref, cls_ref, out_ref, *, b_true, n_true,
                      mask_cols, mask_rows):
    """distillation_type == 'none': plain cross entropy, no teacher path."""
    tb, NP = cls_ref.shape
    col = jax.lax.broadcasted_iota(jnp.int32, (tb, NP), 1)
    logits = cls_ref[...].astype(jnp.float32)
    if mask_cols:
        logits = jnp.where(col < n_true, logits, NEG_INF)
    base = jnp.sum(_ce_rows(logits, lbl_ref[...], col, mask_rows))
    out_ref[...] = _scalar_tile((8, 128), base / b_true)[None]


def _distill_kernel(lbl_ref, cls_ref, kd_ref, x_ref, w_ref, b_ref,
                    out_ref, acc_ref, base_sc, *,
                    distillation_type, alpha, tau, n_true, b_true,
                    mask_cols, mask_rows):
    """grid = (batch_tiles, k_tiles); k is the teacher-matmul reduction axis.

    lbl_ref: [tb, 1]  int32 labels (-1 on padded rows)
    cls_ref: [tb, NP] student class-token logits
    kd_ref:  [tb, NP] student dist-token logits
    x_ref:   [tb, tk] flattened teacher inputs (K tile)
    w_ref:   [tk, NP] teacher linear weight (K tile)
    b_ref:   [1, NP]  teacher linear bias
    out_ref: [1, 8, 128] per-batch-tile partial loss (value at [0,0,0])
    acc_ref: [tb, NP] f32 teacher-logit accumulator (VMEM scratch)
    base_sc: [8, 128] f32 scratch holding the hoisted base-CE partial at [0,0]
    """
    k = pl.program_id(1)
    nk = pl.num_programs(1)

    prod = jnp.dot(x_ref[...], w_ref[...], preferred_element_type=jnp.float32)

    @pl.when(k == 0)
    def _():
        acc_ref[...] = prod          # direct store: no zero-fill + add pass

        # Teacher-independent half of the loss (base CE on class-token logits).
        # Done at k==0 so its EUP/XLU/VPU work overlaps the MXU/DMA of the
        # remaining K steps instead of lengthening the per-batch-tile tail.
        tb, NP = cls_ref.shape
        col = jax.lax.broadcasted_iota(jnp.int32, (tb, NP), 1)
        logits = cls_ref[...].astype(jnp.float32)
        if mask_cols:
            logits = jnp.where(col < n_true, logits, NEG_INF)
        base = jnp.sum(_ce_rows(logits, lbl_ref[...], col, mask_rows))
        base_sc[...] = _scalar_tile(base_sc.shape, base)

    @pl.when(k > 0)
    def _():
        acc_ref[...] += prod

    @pl.when(k == nk - 1)
    def _():
        tb, NP = acc_ref.shape
        col = jax.lax.broadcasted_iota(jnp.int32, (tb, NP), 1)
        lbl = lbl_ref[...]                                       # [tb, 1]
        t_raw = acc_ref[...] + b_ref[...].astype(jnp.float32)    # teacher logits
        kd_raw = kd_ref[...].astype(jnp.float32)                 # dist-token logits

        if distillation_type == 'soft':
            inv_t = 1.0 / tau
            t_s = t_raw * inv_t
            kd_s = kd_raw * inv_t
            if mask_cols:
                t_s = jnp.where(col < n_true, t_s, NEG_INF)
                kd_s = jnp.where(col < n_true, kd_s, NEG_INF)
            # teacher softmax computed once; max / log-denominator reused
            m_t = jnp.max(t_s, axis=-1, keepdims=True)
            e_t = jnp.exp(t_s - m_t)
            se_t = jnp.sum(e_t, axis=-1, keepdims=True)
            p_t = e_t * pl.reciprocal(se_t, approx=True)   # EUP, no full-tile divide
            lsm_t = (t_s - m_t) - jnp.log(se_t)
            m_k = jnp.max(kd_s, axis=-1, keepdims=True)
            se_k = jnp.sum(jnp.exp(kd_s - m_k), axis=-1, keepdims=True)
            lsm_kd = (kd_s - m_k) - jnp.log(se_k)
            # F.kl_div(input=lsm_kd, target=lsm_t, reduction='sum', log_target=True)
            kl_rows = jnp.sum(p_t * (lsm_t - lsm_kd), axis=-1, keepdims=True)
            if mask_rows:
                kl_rows = jnp.where(lbl >= 0, kl_rows, 0.0)
            dist = jnp.sum(kl_rows) * (tau * tau) / (b_true * float(n_true))
        else:  # 'hard'
            t_l = t_raw
            kd_l = kd_raw
            if mask_cols:
                t_l = jnp.where(col < n_true, t_l, NEG_INF)
                kd_l = jnp.where(col < n_true, kd_l, NEG_INF)
            # argmax via first-index-of-row-max (matches torch.argmax tie-break)
            rowmax = jnp.max(t_l, axis=-1, keepdims=True)
            arg = jnp.min(jnp.where(t_l == rowmax, col, NP), axis=-1, keepdims=True)
            ce = _ce_rows(kd_l, arg, col, False)
            if mask_rows:
                ce = jnp.where(lbl >= 0, ce, 0.0)
            dist = jnp.sum(ce) / b_true

        out_ref[...] = (base_sc[...] * ((1.0 - alpha) / b_true)
                        + _scalar_tile(base_sc.shape, dist * alpha))[None]


def _pick_tk(D, NP, w_itemsize, vmem_cap):
    """K (reduction) tile for the teacher matmul.

    Large tiles cut grid steps / weight re-streams; bounded so the
    double-buffered (tk, NP) weight tile plus a (256, tk) x tile stay well
    inside VMEM (tighter on v7x's 64 MiB than on v5e/v6e's 128 MiB).
    """
    budget = vmem_cap // 4
    tk_cap = 2048 if vmem_cap >= (96 << 20) else 1024
    while tk_cap > 128 and (2 * tk_cap * NP + 2 * 256 * tk_cap) * w_itemsize > budget:
        tk_cap //= 2
    for cand in (2048, 1024, 512, 256, 128):     # prefer tk | D -> no x/w padding
        if cand <= tk_cap and D % cand == 0:
            return cand
    if D <= tk_cap:
        return _round_up(D, 128)
    return tk_cap


def _pick_tb(B, NP, stu_itemsize, vmem_cap):
    """Batch tile: fill the 256-wide MXU (v6e/v7x) unless VMEM says otherwise."""
    if B <= 256:
        return _round_up(max(B, 16), 16)         # 16 also covers bf16 sublane packing
    for tb in (256, 128):
        epi = (2 * 2 * tb * NP * stu_itemsize    # cls + kd logits, double-buffered
               + tb * NP * 4                     # f32 teacher-logit accumulator
               + 8 * tb * NP * 4)                # epilogue f32 temporaries
        if epi <= vmem_cap // 3:
            return tb
    return 128


def make_distillation_loss(teacher_w, teacher_b, *, distillation_type='soft',
                           alpha=0.5, tau=1.0):
    """Build a loss fn mirroring DistillationLoss.forward with a linear teacher.

    Teacher parameters are padded to lane/tile-aligned shapes ONCE here (not on
    every loss call).  The returned fn takes (inputs, outputs, outputs_kd, labels).
    """
    assert distillation_type in ('none', 'soft', 'hard')
    vmem_cap = _vmem_capacity_bytes()

    D, N = teacher_w.shape
    NP = _round_up(N, 128)                       # lane-dense class axis
    tk = _pick_tk(D, NP, teacher_w.dtype.itemsize, vmem_cap)
    DP = _round_up(D, tk)
    nk = DP // tk

    w_p = teacher_w
    if (DP, NP) != tuple(teacher_w.shape):
        w_p = jnp.pad(teacher_w, ((0, DP - D), (0, NP - N)))
    b_p = teacher_b.reshape(1, N)
    if NP != N:
        b_p = jnp.pad(b_p, ((0, 0), (0, NP - N)))

    def pad2(a, rows, cols):
        pr, pc = rows - a.shape[0], cols - a.shape[1]
        return a if (pr == 0 and pc == 0) else jnp.pad(a, ((0, pr), (0, pc)))

    def loss_fn(inputs, outputs, outputs_kd, labels):
        B, n = outputs.shape
        assert n == N
        tb = _pick_tb(B, NP, outputs.dtype.itemsize, vmem_cap)
        BP = _round_up(B, tb)
        nb = BP // tb
        mask_cols = (NP != N)
        mask_rows = (BP != B)

        lbl = labels.astype(jnp.int32).reshape(B, 1)
        if mask_rows:
            lbl = jnp.pad(lbl, ((0, BP - B), (0, 0)), constant_values=-1)
        cls_p = pad2(outputs, BP, NP)

        out_block = (1, 8, 128)
        out_shape = jax.ShapeDtypeStruct((nb, 8, 128), jnp.float32)

        if distillation_type == 'none':
            kernel = functools.partial(_base_only_kernel, b_true=float(B), n_true=N,
                                       mask_cols=mask_cols, mask_rows=mask_rows)
            partials = pl.pallas_call(
                kernel,
                out_shape=out_shape,
                grid=(nb,),
                in_specs=[pl.BlockSpec((tb, 1), lambda b: (b, 0)),
                          pl.BlockSpec((tb, NP), lambda b: (b, 0))],
                out_specs=pl.BlockSpec(out_block, lambda b: (b, 0, 0)),
                compiler_params=pltpu.CompilerParams(
                    dimension_semantics=("parallel",)),
            )(lbl, cls_p)
            return jnp.sum(partials)

        if outputs_kd is None:
            raise ValueError("distillation requires (class_token, dist_token) outputs")

        kd_p = pad2(outputs_kd, BP, NP)
        x = inputs.reshape(B, -1)
        assert x.shape[1] == D
        x_p = pad2(x, BP, DP)                    # native dtype (bf16 in the demo)

        kernel = functools.partial(_distill_kernel,
                                   distillation_type=distillation_type,
                                   alpha=float(alpha), tau=float(tau),
                                   n_true=N, b_true=float(B),
                                   mask_cols=mask_cols, mask_rows=mask_rows)

        # VMEM budget: double-buffered streams + accumulator + epilogue f32
        # temporaries + explicit headroom, capped well inside physical VMEM
        # (~40 MiB on v7x's 64 MiB parts, ~80 MiB on v5e/v6e's 128 MiB parts).
        est = (2 * tb * tk * x_p.dtype.itemsize        # teacher inputs (double-buf)
               + 2 * tk * NP * w_p.dtype.itemsize      # teacher weight (double-buf)
               + 2 * tb * NP * cls_p.dtype.itemsize    # class-token logits
               + 2 * tb * NP * kd_p.dtype.itemsize     # dist-token logits
               + tb * NP * 4                           # f32 accumulator scratch
               + 8 * tb * NP * 4                       # epilogue f32 temporaries
               + 2 * tb * 4 + 2 * NP * 4               # labels + bias
               + 3 * 8 * 128 * 4)                      # output tile + base scratch
        hard_cap = min((vmem_cap * 5) // 8, vmem_cap - (24 << 20))
        vmem_limit = int(min(max(est + (8 << 20), 16 << 20), hard_cap))

        # TODO(synk): when nb > 1 and the teacher weight stream dominates HBM
        # traffic, flip the grid to (k, b) with a persistent (BP, NP) f32
        # accumulator so the weight is streamed exactly once instead of nb times.
        partials = pl.pallas_call(
            kernel,
            out_shape=out_shape,
            grid=(nb, nk),
            in_specs=[
                pl.BlockSpec((tb, 1), lambda b, k: (b, 0)),     # labels
                pl.BlockSpec((tb, NP), lambda b, k: (b, 0)),    # class-token logits
                pl.BlockSpec((tb, NP), lambda b, k: (b, 0)),    # dist-token logits
                pl.BlockSpec((tb, tk), lambda b, k: (b, k)),    # teacher inputs
                pl.BlockSpec((tk, NP), lambda b, k: (k, 0)),    # teacher weight
                pl.BlockSpec((1, NP), lambda b, k: (0, 0)),     # teacher bias
            ],
            out_specs=pl.BlockSpec(out_block, lambda b, k: (b, 0, 0)),
            scratch_shapes=[pltpu.VMEM((tb, NP), jnp.float32),  # teacher-logit acc
                            pltpu.VMEM((8, 128), jnp.float32)], # hoisted base CE
            compiler_params=pltpu.CompilerParams(
                dimension_semantics=("parallel", "arbitrary"),
                vmem_limit_bytes=vmem_limit),
        )(lbl, cls_p, kd_p, x_p, w_p, b_p)
        return jnp.sum(partials)

    return loss_fn


def _reference(inputs, outputs, outputs_kd, labels, teacher_w, teacher_b, *,
               distillation_type, alpha, tau):
    """Pure-JAX reference of the PyTorch forward for a sanity check."""
    B, N = outputs.shape
    lsm_out = jax.nn.log_softmax(outputs.astype(jnp.float32), axis=1)
    base = jnp.mean(-jnp.take_along_axis(lsm_out, labels[:, None], axis=1))
    if distillation_type == 'none':
        return base
    x = inputs.reshape(B, -1)
    teacher = (jnp.dot(x, teacher_w, preferred_element_type=jnp.float32)
               + teacher_b.astype(jnp.float32))
    kd = outputs_kd.astype(jnp.float32)
    if distillation_type == 'soft':
        T = tau
        li = jax.nn.log_softmax(kd / T, axis=1)
        lt = jax.nn.log_softmax(teacher / T, axis=1)
        dist = jnp.sum(jnp.exp(lt) * (lt - li)) * (T * T) / (B * N)
    else:
        tgt = jnp.argmax(teacher, axis=1)
        lsm = jax.nn.log_softmax(kd, axis=1)
        dist = jnp.mean(-lsm[jnp.arange(B), tgt])
    return base * (1 - alpha) + dist * alpha


if __name__ == "__main__":
    key = jax.random.PRNGKey(0)
    k_in, k_out, k_kd, k_lbl, k_w, k_b = jax.random.split(key, 6)

    B, C, H, W = 2, 4, 16, 16
    N = 32                       # num classes
    D = C * H * W

    # teacher inputs / weights in bf16 (halves HBM traffic, bf16-native MXU)
    inputs = jax.random.normal(k_in, (B, C, H, W), dtype=jnp.bfloat16)
    teacher_w = 0.02 * jax.random.normal(k_w, (D, N), dtype=jnp.bfloat16)
    teacher_b = 0.01 * jax.random.normal(k_b, (N,), dtype=jnp.float32)

    outputs = jax.random.normal(k_out, (B, N), dtype=jnp.float32)
    outputs_kd = jax.random.normal(k_kd, (B, N), dtype=jnp.float32)
    labels = jax.random.randint(k_lbl, (B,), 0, N, dtype=jnp.int32)

    alpha, tau = 0.5, 2.0

    for dtype_ in ('soft', 'hard', 'none'):
        loss_fn = make_distillation_loss(teacher_w, teacher_b,
                                         distillation_type=dtype_,
                                         alpha=alpha, tau=tau)
        got = jax.block_until_ready(loss_fn(inputs, outputs, outputs_kd, labels))
        ref = _reference(inputs, outputs, outputs_kd, labels,
                         teacher_w, teacher_b,
                         distillation_type=dtype_, alpha=alpha, tau=tau)
        # tolerance covers the bf16 teacher matmul and the approx EUP reciprocal
        assert jnp.allclose(got, ref, rtol=2e-3, atol=1e-4), (dtype_, got, ref)

    print("KERNEL_OK")
</pallas_src>

<mosaic_0001>
module attributes {stable_mosaic.version = 11 : i64} {
  func.func @_distill_kernel(%arg0: i32, %arg1: i32, %arg2: memref<16x1xi32, #tpu.memory_space<vmem>>, %arg3: memref<16x128xf32, #tpu.memory_space<vmem>>, %arg4: memref<16x128xf32, #tpu.memory_space<vmem>>, %arg5: memref<16x1024xbf16, #tpu.memory_space<vmem>>, %arg6: memref<1024x128xbf16, #tpu.memory_space<vmem>>, %arg7: memref<1x128xf32, #tpu.memory_space<vmem>>, %arg8: memref<1x8x128xf32, #tpu.memory_space<vmem>>, %arg9: memref<16x128xf32, #tpu.memory_space<vmem>>, %arg10: memref<8x128xf32, #tpu.memory_space<vmem>>) attributes {dimension_semantics = [#tpu.dimension_semantics<parallel>, #tpu.dimension_semantics<arbitrary>], iteration_bounds = array<i64: 1, 1>, scalar_prefetch = 0 : i64, scratch_operands = 2 : i64, tpu.core_type = #tpu.core_type<tc>, window_params = [{transform_indices = @transform_0, window_bounds = array<i64: 16, 1>}, {transform_indices = @transform_1, window_bounds = array<i64: 16, 128>}, {transform_indices = @transform_2, window_bounds = array<i64: 16, 128>}, {transform_indices = @transform_3, window_bounds = array<i64: 16, 1024>}, {transform_indices = @transform_4, window_bounds = array<i64: 1024, 128>}, {pipeline_mode = #tpu.pipeline_mode<synchronous>, transform_indices = @transform_5, window_bounds = array<i64: 1, 128>}, {transform_indices = @transform_6, window_bounds = array<i64: 1, 8, 128>}]} {
    %c0 = arith.constant 0 : index
    %c0_0 = arith.constant 0 : index
    %0 = vector.load %arg5[%c0, %c0_0] : memref<16x1024xbf16, #tpu.memory_space<vmem>>, vector<16x1024xbf16>
    %c0_1 = arith.constant 0 : index
    %c0_2 = arith.constant 0 : index
    %1 = vector.load %arg6[%c0_1, %c0_2] : memref<1024x128xbf16, #tpu.memory_space<vmem>>, vector<1024x128xbf16>
    %cst = arith.constant dense<0.000000e+00> : vector<16x128xf32>
    %2 = tpu.matmul %0, %1, %cst {dimension_numbers = #tpu.dot_dimension_numbers<[1], [0], [0], [1], [0, 0, 1, 1], [], []>} : vector<16x1024xbf16>, vector<1024x128xbf16>, vector<16x128xf32> -> vector<16x128xf32>
    %c0_i32 = arith.constant 0 : i32
    %3 = arith.cmpi eq, %arg1, %c0_i32 : i32
    %4 = arith.extui %3 : i1 to i32
    %c0_i32_3 = arith.constant 0 : i32
    %5 = arith.cmpi ne, %4, %c0_i32_3 : i32
    scf.if %5 {
      %c0_8 = arith.constant 0 : index
      %c0_9 = arith.constant 0 : index
      %12 = vector.load %arg9[%c0_8, %c0_9] : memref<16x128xf32, #tpu.memory_space<vmem>>, vector<16x128xf32>
      tpu.vector_store %arg9[%c0_8, %c0_9], %2 {strides = array<i32>} : memref<16x128xf32, #tpu.memory_space<vmem>>, vector<16x128xf32>,
      %13 = tpu.iota {dimensions = array<i32: 1>} : vector<16x128xi32>
      %c0_10 = arith.constant 0 : index
      %c0_11 = arith.constant 0 : index
      %14 = vector.load %arg3[%c0_10, %c0_11] : memref<16x128xf32, #tpu.memory_space<vmem>>, vector<16x128xf32>
      %c32_i32 = arith.constant 32 : i32
      %15 = vector.broadcast %c32_i32 : i32 to vector<16x128xi32>
      %16 = arith.cmpi slt, %13, %15 : vector<16x128xi32>
      %cst_12 = arith.constant -1.000000e+30 : f32
      %17 = vector.broadcast %cst_12 : f32 to vector<16x128xf32>
      %18 = arith.select %16, %14, %17 : vector<16x128xi1>, vector<16x128xf32>
      %c0_13 = arith.constant 0 : index
      %c0_14 = arith.constant 0 : index
      %19 = vector.load %arg2[%c0_13, %c0_14] : memref<16x1xi32, #tpu.memory_space<vmem>>, vector<16x1xi32>
      %cst_15 = arith.constant dense<0xFF800000> : vector<16xf32>
      %20 = vector.multi_reduction <maximumf>, %18, %cst_15 [1] : vector<16x128xf32> to vector<16xf32>
      %21 = vector.shape_cast %20 : vector<16xf32> to vector<16x1xf32>
      %22 = vector.broadcast %21 : vector<16x1xf32> to vector<16x128xf32>
      %23 = arith.subf %18, %22 : vector<16x128xf32>
      %24 = math.exp %23 : vector<16x128xf32>
      %cst_16 = arith.constant dense<0.000000e+00> : vector<16xf32>
      %25 = vector.multi_reduction <add>, %24, %cst_16 [1] : vector<16x128xf32> to vector<16xf32>
      %26 = vector.shape_cast %25 : vector<16xf32> to vector<16x1xf32>
      %27 = math.log %26 : vector<16x1xf32>
      %28 = arith.addf %21, %27 : vector<16x1xf32>
      %29 = vector.broadcast %19 : vector<16x1xi32> to vector<16x128xi32>
      %30 = arith.cmpi eq, %13, %29 : vector<16x128xi32>
      %cst_17 = arith.constant 0.000000e+00 : f32
      %31 = vector.broadcast %cst_17 : f32 to vector<16x128xf32>
      %32 = arith.select %30, %18, %31 : vector<16x128xi1>, vector<16x128xf32>
      %cst_18 = arith.constant dense<0.000000e+00> : vector<16xf32>
      %33 = vector.multi_reduction <add>, %32, %cst_18 [1] : vector<16x128xf32> to vector<16xf32>
      %34 = vector.shape_cast %33 : vector<16xf32> to vector<16x1xf32>
      %35 = arith.subf %28, %34 : vector<16x1xf32>
      %c0_i32_19 = arith.constant 0 : i32
      %36 = vector.broadcast %c0_i32_19 : i32 to vector<16x1xi32>
      %37 = arith.cmpi sge, %19, %36 : vector<16x1xi32>
      %cst_20 = arith.constant 0.000000e+00 : f32
      %38 = vector.broadcast %cst_20 : f32 to vector<16x1xf32>
      %39 = arith.select %37, %35, %38 : vector<16x1xi1>, vector<16x1xf32>
      %40 = vector.shape_cast %39 : vector<16x1xf32> to vector<1x16x1xf32>
      %cst_21 = arith.constant dense<0.000000e+00> : vector<1xf32>
      %41 = vector.multi_reduction <add>, %40, %cst_21 [1, 2] : vector<1x16x1xf32> to vector<1xf32>
      %42 = vector.shape_cast %41 : vector<1xf32> to vector<1x1x1xf32>
      %43 = vector.extract %42[0, 0, 0] : f32 from vector<1x1x1xf32>
      %44 = tpu.iota {dimensions = array<i32: 0>} : vector<8x128xi32>
      %45 = tpu.iota {dimensions = array<i32: 1>} : vector<8x128xi32>
      %c0_i32_22 = arith.constant 0 : i32
      %46 = vector.broadcast %c0_i32_22 : i32 to vector<8x128xi32>
      %47 = arith.cmpi eq, %44, %46 : vector<8x128xi32>
      %c0_i32_23 = arith.constant 0 : i32
      %48 = vector.broadcast %c0_i32_23 : i32 to vector<8x128xi32>
      %49 = arith.cmpi eq, %45, %48 : vector<8x128xi32>
      %50 = arith.andi %47, %49 : vector<8x128xi1>
      %cst_24 = arith.constant 0.000000e+00 : f32
      %51 = vector.broadcast %43 : f32 to vector<8x128xf32>
      %52 = vector.broadcast %cst_24 : f32 to vector<8x128xf32>
      %53 = arith.select %50, %51, %52 : vector<8x128xi1>, vector<8x128xf32>
      %c0_25 = arith.constant 0 : index
      %c0_26 = arith.constant 0 : index
      %54 = vector.load %arg10[%c0_25, %c0_26] : memref<8x128xf32, #tpu.memory_space<vmem>>, vector<8x128xf32>
      tpu.vector_store %arg10[%c0_25, %c0_26], %53 {strides = array<i32>} : memref<8x128xf32, #tpu.memory_space<vmem>>, vector<8x128xf32>,
    } else {
    }
    %c0_i32_4 = arith.constant 0 : i32
    %6 = arith.cmpi sgt, %arg1, %c0_i32_4 : i32
    %7 = arith.extui %6 : i1 to i32
    %c0_i32_5 = arith.constant 0 : i32
    %8 = arith.cmpi ne, %7, %c0_i32_5 : i32
    scf.if %8 {
      %c0_8 = arith.constant 0 : index
      %c0_9 = arith.constant 0 : index
      %12 = vector.load %arg9[%c0_8, %c0_9] : memref<16x128xf32, #tpu.memory_space<vmem>>, vector<16x128xf32>
      %13 = arith.addf %12, %2 : vector<16x128xf32>
      %c0_10 = arith.constant 0 : index
      %c0_11 = arith.constant 0 : index
      %14 = vector.load %arg9[%c0_10, %c0_11] : memref<16x128xf32, #tpu.memory_space<vmem>>, vector<16x128xf32>
      tpu.vector_store %arg9[%c0_10, %c0_11], %13 {strides = array<i32>} : memref<16x128xf32, #tpu.memory_space<vmem>>, vector<16x128xf32>,
    } else {
    }
    %c0_i32_6 = arith.constant 0 : i32
    %9 = arith.cmpi eq, %arg1, %c0_i32_6 : i32
    %10 = arith.extui %9 : i1 to i32
    %c0_i32_7 = arith.constant 0 : i32
    %11 = arith.cmpi ne, %10, %c0_i32_7 : i32
    scf.if %11 {
      %12 = tpu.iota {dimensions = array<i32: 1>} : vector<16x128xi32>
      %c0_8 = arith.constant 0 : index
      %c0_9 = arith.constant 0 : index
      %13 = vector.load %arg2[%c0_8, %c0_9] : memref<16x1xi32, #tpu.memory_space<vmem>>, vector<16x1xi32>
      %c0_10 = arith.constant 0 : index
      %c0_11 = arith.constant 0 : index
      %14 = vector.load %arg9[%c0_10, %c0_11] : memref<16x128xf32, #tpu.memory_space<vmem>>, vector<16x128xf32>
      %c0_12 = arith.constant 0 : index
      %c0_13 = arith.constant 0 : index
      %15 = vector.load %arg7[%c0_12, %c0_13] : memref<1x128xf32, #tpu.memory_space<vmem>>, vector<1x128xf32>
      %16 = vector.broadcast %15 : vector<1x128xf32> to vector<16x128xf32>
      %17 = arith.addf %14, %16 : vector<16x128xf32>
      %c0_14 = arith.constant 0 : index
      %c0_15 = arith.constant 0 : index
      %18 = vector.load %arg4[%c0_14, %c0_15] : memref<16x128xf32, #tpu.memory_space<vmem>>, vector<16x128xf32>
      %cst_16 = arith.constant 5.000000e-01 : f32
      %19 = vector.broadcast %cst_16 : f32 to vector<16x128xf32>
      %20 = arith.mulf %17, %19 : vector<16x128xf32>
      %cst_17 = arith.constant 5.000000e-01 : f32
      %21 = vector.broadcast %cst_17 : f32 to vector<16x128xf32>
      %22 = arith.mulf %18, %21 : vector<16x128xf32>
      %c32_i32 = arith.constant 32 : i32
      %23 = vector.broadcast %c32_i32 : i32 to vector<16x128xi32>
      %24 = arith.cmpi slt, %12, %23 : vector<16x128xi32>
      %cst_18 = arith.constant -1.000000e+30 : f32
      %25 = vector.broadcast %cst_18 : f32 to vector<16x128xf32>
      %26 = arith.select %24, %20, %25 : vector<16x128xi1>, vector<16x128xf32>
      %c32_i32_19 = arith.constant 32 : i32
      %27 = vector.broadcast %c32_i32_19 : i32 to vector<16x128xi32>
      %28 = arith.cmpi slt, %12, %27 : vector<16x128xi32>
      %cst_20 = arith.constant -1.000000e+30 : f32
      %29 = vector.broadcast %cst_20 : f32 to vector<16x128xf32>
      %30 = arith.select %28, %22, %29 : vector<16x128xi1>, vector<16x128xf32>
      %cst_21 = arith.constant dense<0xFF800000> : vector<16xf32>
      %31 = vector.multi_reduction <maximumf>, %26, %cst_21 [1] : vector<16x128xf32> to vector<16xf32>
      %32 = vector.shape_cast %31 : vector<16xf32> to vector<16x1xf32>
      %33 = vector.broadcast %32 : vector<16x1xf32> to vector<16x128xf32>
      %34 = arith.subf %26, %33 : vector<16x128xf32>
      %35 = math.exp %34 : vector<16x128xf32>
      %cst_22 = arith.constant dense<0.000000e+00> : vector<16xf32>
      %36 = vector.multi_reduction <add>, %35, %cst_22 [1] : vector<16x128xf32> to vector<16xf32>
      %37 = vector.shape_cast %36 : vector<16xf32> to vector<16x1xf32>
      %38 = tpu.reciprocal %37 {approx = true} : vector<16x1xf32> -> vector<16x1xf32>
      %39 = vector.broadcast %38 : vector<16x1xf32> to vector<16x128xf32>
      %40 = arith.mulf %35, %39 : vector<16x128xf32>
      %41 = vector.broadcast %32 : vector<16x1xf32> to vector<16x128xf32>
      %42 = arith.subf %26, %41 : vector<16x128xf32>
      %43 = math.log %37 : vector<16x1xf32>
      %44 = vector.broadcast %43 : vector<16x1xf32> to vector<16x128xf32>
      %45 = arith.subf %42, %44 : vector<16x128xf32>
      %cst_23 = arith.constant dense<0xFF800000> : vector<16xf32>
      %46 = vector.multi_reduction <maximumf>, %30, %cst_23 [1] : vector<16x128xf32> to vector<16xf32>
      %47 = vector.shape_cast %46 : vector<16xf32> to vector<16x1xf32>
      %48 = vector.broadcast %47 : vector<16x1xf32> to vector<16x128xf32>
      %49 = arith.subf %30, %48 : vector<16x128xf32>
      %50 = math.exp %49 : vector<16x128xf32>
      %cst_24 = arith.constant dense<0.000000e+00> : vector<16xf32>
      %51 = vector.multi_reduction <add>, %50, %cst_24 [1] : vector<16x128xf32> to vector<16xf32>
      %52 = vector.shape_cast %51 : vector<16xf32> to vector<16x1xf32>
      %53 = vector.broadcast %47 : vector<16x1xf32> to vector<16x128xf32>
      %54 = arith.subf %30, %53 : vector<16x128xf32>
      %55 = math.log %52 : vector<16x1xf32>
      %56 = vector.broadcast %55 : vector<16x1xf32> to vector<16x128xf32>
      %57 = arith.subf %54, %56 : vector<16x128xf32>
      %58 = arith.subf %45, %57 : vector<16x128xf32>
      %59 = arith.mulf %40, %58 : vector<16x128xf32>
      %cst_25 = arith.constant dense<0.000000e+00> : vector<16xf32>
      %60 = vector.multi_reduction <add>, %59, %cst_25 [1] : vector<16x128xf32> to vector<16xf32>
      %61 = vector.shape_cast %60 : vector<16xf32> to vector<16x1xf32>
      %c0_i32_26 = arith.constant 0 : i32
      %62 = vector.broadcast %c0_i32_26 : i32 to vector<16x1xi32>
      %63 = arith.cmpi sge, %13, %62 : vector<16x1xi32>
      %cst_27 = arith.constant 0.000000e+00 : f32
      %64 = vector.broadcast %cst_27 : f32 to vector<16x1xf32>
      %65 = arith.select %63, %61, %64 : vector<16x1xi1>, vector<16x1xf32>
      %66 = vector.shape_cast %65 : vector<16x1xf32> to vector<1x16x1xf32>
      %cst_28 = arith.constant dense<0.000000e+00> : vector<1xf32>
      %67 = vector.multi_reduction <add>, %66, %cst_28 [1, 2] : vector<1x16x1xf32> to vector<1xf32>
      %68 = vector.shape_cast %67 : vector<1xf32> to vector<1x1x1xf32>
      %69 = vector.extract %68[0, 0, 0] : f32 from vector<1x1x1xf32>
      %cst_29 = arith.constant 4.000000e+00 : f32
      %70 = arith.mulf %69, %cst_29 : f32
      %cst_30 = arith.constant 6.400000e+01 : f32
      %71 = arith.divf %70, %cst_30 : f32
      %c0_31 = arith.constant 0 : index
      %c0_32 = arith.constant 0 : index
      %72 = vector.load %arg10[%c0_31, %c0_32] : memref<8x128xf32, #tpu.memory_space<vmem>>, vector<8x128xf32>
      %cst_33 = arith.constant 2.500000e-01 : f32
      %73 = vector.broadcast %cst_33 : f32 to vector<8x128xf32>
      %74 = arith.mulf %72, %73 : vector<8x128xf32>
      %cst_34 = arith.constant 5.000000e-01 : f32
      %75 = arith.mulf %71, %cst_34 : f32
      %76 = tpu.iota {dimensions = array<i32: 0>} : vector<8x128xi32>
      %77 = tpu.iota {dimensions = array<i32: 1>} : vector<8x128xi32>
      %c0_i32_35 = arith.constant 0 : i32
      %78 = vector.broadcast %c0_i32_35 : i32 to vector<8x128xi32>
      %79 = arith.cmpi eq, %76, %78 : vector<8x128xi32>
      %c0_i32_36 = arith.constant 0 : i32
      %80 = vector.broadcast %c0_i32_36 : i32 to vector<8x128xi32>
      %81 = arith.cmpi eq, %77, %80 : vector<8x128xi32>
      %82 = arith.andi %79, %81 : vector<8x128xi1>
      %cst_37 = arith.constant 0.000000e+00 : f32
      %83 = vector.broadcast %75 : f32 to vector<8x128xf32>
      %84 = vector.broadcast %cst_37 : f32 to vector<8x128xf32>
      %85 = arith.select %82, %83, %84 : vector<8x128xi1>, vector<8x128xf32>
      %86 = arith.addf %74, %85 : vector<8x128xf32>
      %87 = vector.shape_cast %86 : vector<8x128xf32> to vector<1x8x128xf32>
      %c0_38 = arith.constant 0 : index
      %c0_39 = arith.constant 0 : index
      %c0_40 = arith.constant 0 : index
      %88 = vector.load %arg8[%c0_38, %c0_39, %c0_40] : memref<1x8x128xf32, #tpu.memory_space<vmem>>, vector<1x8x128xf32>
      tpu.vector_store %arg8[%c0_38, %c0_39, %c0_40], %87 {strides = array<i32>} : memref<1x8x128xf32, #tpu.memory_space<vmem>>, vector<1x8x128xf32>,
    } else {
    }
    return
  }
  func.func @transform_0(%arg0: i32, %arg1: i32) -> (i32, i32) {
    %c0_i32 = arith.constant 0 : i32
    %c0_i32_0 = arith.constant 0 : i32
    return %arg0, %c0_i32 : i32, i32
  }
  func.func @transform_1(%arg0: i32, %arg1: i32) -> (i32, i32) {
    %c0_i32 = arith.constant 0 : i32
    %c0_i32_0 = arith.constant 0 : i32
    return %arg0, %c0_i32 : i32, i32
  }
  func.func @transform_2(%arg0: i32, %arg1: i32) -> (i32, i32) {
    %c0_i32 = arith.constant 0 : i32
    %c0_i32_0 = arith.constant 0 : i32
    return %arg0, %c0_i32 : i32, i32
  }
  func.func @transform_3(%arg0: i32, %arg1: i32) -> (i32, i32) {
    %c0_i32 = arith.constant 0 : i32
    return %arg0, %arg1 : i32, i32
  }
  func.func @transform_4(%arg0: i32, %arg1: i32) -> (i32, i32) {
    %c0_i32 = arith.constant 0 : i32
    %c0_i32_0 = arith.constant 0 : i32
    return %arg1, %c0_i32 : i32, i32
  }
  func.func @transform_5(%arg0: i32, %arg1: i32) -> (i32, i32) {
    %c0_i32 = arith.constant 0 : i32
    %c0_i32_0 = arith.constant 0 : i32
    %c0_i32_1 = arith.constant 0 : i32
    return %c0_i32, %c0_i32_0 : i32, i32
  }
  func.func @transform_6(%arg0: i32, %arg1: i32) -> (i32, i32, i32) {
    %c0_i32 = arith.constant 0 : i32
    %c0_i32_0 = arith.constant 0 : i32
    %c0_i32_1 = arith.constant 0 : i32
    return %arg0, %c0_i32, %c0_i32_0 : i32, i32, i32
  }
}

</mosaic_0001>

<bundles_post_ra>
// kernel: tpu_custom_call.1
= control target key start
LH: loop header
LB: loop body
LE: loop exit
PB: predicated region body
PF: predicated region fallthrough
CT: control target
= control target key end

     0   :  { %11 = vsyncpa [#allocation5], 0  ;;  %s1524_s0 = inlined_call_operand.vmem [shape: s32[16,1], index: 0, kind: input, shape index: {}]   ;;  %s1525_s1 = inlined_call_operand.vmem [shape: f32[16,128], index: 1, kind: input, shape index: {}]   ;;  %s1526_s2 = inlined_call_operand.hbm [shape: f32[16,128], index: 2, kind: input, shape index: {}]   ;;  %s1527_s3 = inlined_call_operand.hbm [shape: bf16[16,1024], index: 3, kind: input, shape index: {}]   ;;  %s1528_s4 = inlined_call_operand.hbm [shape: bf16[1024,128], index: 4, kind: input, shape index: {}]   ;;  %s1529_s5 = inlined_call_operand.vmem [shape: f32[1,128], index: 5, kind: input, shape index: {}]   ;;  %s1530_s6 = inlined_call_operand.hbm [shape: f32[1,8,128], index: 6, kind: output, shape index: {}]  }
   0x1   :  { %12 = vsyncpa [#allocation8], 0 }
   0x2   :  { %13 = vsyncpa [#allocation6], 0  ;;  %s1370_s21 = smov [#allocation7]   ;;  %s1276_s25 = scalar_lea.hbm %s1527_s3, 1024 }
   0x3   :  { %s35_s22 = sshll.u32 %s1370_s21, 4  ;;  %p1277_p0 = scmp.ne.s32.totalorder %s1527_s3, %s1276_s25  ;;  %s36_s22 = int_to_ptr.vmem [resolvable:$true] %s35_s22 }
   0x4   :  { %p1280_p1 = scmp.lt.u32.totalorder %s1276_s25, %s1527_s3 }
   0x6   :  { %p1282_p2 = pnand %p1280_p1, %p1277_p0 }
   0x8   :  { %1285 = shalt.err (!%p1282_p2)
}
   0x9   :  { %s1286_s30 = scalar_lea.vmem %s36_s22, 1024  ;;  %p1291_p4 = scmp.lt.s32.totalorder %s36_s22, %s36_s22 }
   0xa   :  { %p1287_p3 = scmp.ne.s32.totalorder %s36_s22, %s1286_s30  ;;  %p1292_p5 = scmp.lt.s32.totalorder %s1286_s30, %s1286_s30 }
   0xc   :  { %p1293_p6 = por %p1292_p5, %p1291_p4 }
   0xe   :  { %p1294_p7 = pnand %p1293_p6, %p1287_p3 }
  0x10   :  { %1297 = shalt.err (!%p1294_p7)
}
  0x11   :  { %s1371_s7 = smov 512   ;;  %s1372_s8 = smov 32  }
  0x12   :  { %41 = dma.hbm_to_vmem [thread:$0]  %s1527_s3, 1024, %s36_s22, [#allocation8], %s1371_s7, %s1371_s7, %s1372_s8  }
  0x13   :  { %s1373_s11 = smov [#allocation4]   ;;  %s1298_s15 = scalar_lea.hbm %s1526_s2, 256 }
  0x14   :  { %s23_s12 = sshll.u32 %s1373_s11, 4  ;;  %p1299_p8 = scmp.ne.s32.totalorder %s1526_s2, %s1298_s15  ;;  %s24_s12 = int_to_ptr.vmem [resolvable:$true] %s23_s12 }
  0x15   :  { %p1302_p9 = scmp.lt.u32.totalorder %s1298_s15, %s1526_s2 }
  0x17   :  { %p1304_p10 = pnand %p1302_p9, %p1299_p8 }
  0x19   :  { %1307 = shalt.err (!%p1304_p10)
}
  0x1a   :  { %s1308_s20 = scalar_lea.vmem %s24_s12, 256  ;;  %p1313_p12 = scmp.lt.s32.totalorder %s24_s12, %s24_s12 }
  0x1b   :  { %p1309_p11 = scmp.ne.s32.totalorder %s24_s12, %s1308_s20  ;;  %p1314_p13 = scmp.lt.s32.totalorder %s1308_s20, %s1308_s20 }
  0x1d   :  { %p1315_p0 = por %p1314_p13, %p1313_p12 }
  0x1f   :  { %p1316_p1 = pnand %p1315_p0, %p1309_p11 }
  0x21   :  { %1319 = shalt.err (!%p1316_p1)
}
  0x22   :  { %s1374_s3 = smov 128   ;;  %s1375_s21 = smov 8  }
  0x23   :  { %29 = dma.hbm_to_vmem [thread:$0]  %s1526_s2, 256, %s24_s12, [#allocation5], %s1374_s3, %s1374_s3, %s1375_s21  }
  0x24   :  { %s1376_s24 = smov [#allocation9]   ;;  %s1320_s28 = scalar_lea.hbm %s1528_s4, 8192 }
  0x25   :  { %s47_s25 = sshll.u32 %s1376_s24, 4  ;;  %p1321_p2 = scmp.ne.s32.totalorder %s1528_s4, %s1320_s28  ;;  %s48_s25 = int_to_ptr.vmem [resolvable:$true] %s47_s25 }
  0x26   :  { %p1324_p3 = scmp.lt.u32.totalorder %s1320_s28, %s1528_s4 }
  0x28   :  { %p1326_p4 = pnand %p1324_p3, %p1321_p2 }
  0x2a   :  { %1329 = shalt.err (!%p1326_p4)
}
  0x2b   :  { %s1330_s9 = scalar_lea.vmem %s48_s25, 8192  ;;  %p1335_p6 = scmp.lt.s32.totalorder %s48_s25, %s48_s25 }
  0x2c   :  { %p1331_p5 = scmp.ne.s32.totalorder %s48_s25, %s1330_s9  ;;  %p1336_p7 = scmp.lt.s32.totalorder %s1330_s9, %s1330_s9 }
  0x2e   :  { %p1337_p8 = por %p1336_p7, %p1335_p6 }
  0x30   :  { %p1338_p9 = pnand %p1337_p8, %p1331_p5 }
  0x32   :  { %1341 = shalt.err (!%p1338_p9)
}
  0x33   :  { %s1377_s2 = smov 64   ;;  %s1378_s10 = smov 4  }
  0x34   :  { %53 = dma.hbm_to_vmem [thread:$0]  %s1528_s4, 8192, %s48_s25, [#allocation8], %s1377_s2, %s1377_s2, %s1378_s10  }
  0x35   :  { %1364 = dma.done.wait [#allocation5], 256  }
  0x36   :  { %1365 = vsyncadd [#allocation5], 4294967040 }
  0x37   :  { %1366 = dma.done.wait [#allocation8], 9216  }
  0x38   :  { %1367 = vsyncadd [#allocation8], 4294958080  ;;  %v1184_v0 = vld [vmem:[#allocation9 + $0x40] sm:$0xff]   ;;  %v1188_v4 = vld [vmem:[#allocation9 + $0x48] sm:$0xff]   ;;  %vm845_vm5 = vcmask 7168   ;;  %s1380_s23 = smov [#allocation10]  }
  0x39   :  { %v1185_v1 = vld [vmem:[#allocation9 + $0xc0] sm:$0xff]   ;;  %1079 = vmatprep.subr.bf16.mxu0 %v1184_v0  ;;  %v1189_v5 = vld [vmem:[#allocation9 + $0xc8] sm:$0xff]   ;;  %v1192_v8 = vld [vmem:[#allocation9 + $0x50] sm:$0xff]   ;;  %s996_s24 = sshll.u32 %s1380_s23, 4  ;;  %s997_s24 = int_to_ptr.vmem [resolvable:$true] %s996_s24 }
  0x3a   :  { %v1186_v2 = vld [vmem:[#allocation9] sm:$0xff]   ;;  %1101 = vmatprep.subr.bf16.mxu1 %v1185_v1  ;;  %v1190_v6 = vld [vmem:[#allocation9 + $0x8] sm:$0xff]   ;;  %v1193_v9 = vld [vmem:[#allocation9 + $0xd0] sm:$0xff]   ;;  %v796_v1 = vlaneseq  ;;  %s1342_s25 = scalar_lea.vmem %s997_s24, 128  ;;  %p1347_p11 = scmp.lt.s32.totalorder %s997_s24, %s997_s24 }
  0x3b   :  { %v1187_v3 = vld [vmem:[#allocation9 + $0x80] sm:$0xff]   ;;  %1080 = vmatpush3.bf16.msra.mxu0 %v1186_v2  ;;  %v1191_v7 = vld [vmem:[#allocation9 + $0x88] sm:$0xff]   ;;  %v1194_v10 = vld [vmem:[#allocation9 + $0x10] sm:$0xff]   ;;  %p1343_p10 = scmp.ne.s32.totalorder %s997_s24, %s1342_s25  ;;  %p1348_p12 = scmp.lt.s32.totalorder %s1342_s25, %s1342_s25 }
  0x3c   :  { %1102 = vmatpush3.bf16.msra.mxu1 %v1187_v3  ;;  %1081 = vmatprep.subr.bf16.mxu0 %v1188_v4  ;;  %v1195_v11 = vld [vmem:[#allocation9 + $0x90] sm:$0xff]   ;;  %v1196_v12 = vld [vmem:[#allocation9 + $0x58] sm:$0xff]   ;;  %v1200_v16 = vld [vmem:[#allocation9 + $0x60] sm:$0xff]  }
  0x3d   :  { %1103 = vmatprep.subr.bf16.mxu1 %v1189_v5  ;;  %v1197_v13 = vld [vmem:[#allocation9 + $0xd8] sm:$0xff]   ;;  %v1201_v17 = vld [vmem:[#allocation9 + $0xe0] sm:$0xff]   ;;  %v1204_v20 = vld [vmem:[#allocation9 + $0x68] sm:$0xff]   ;;  %p1349_p13 = por %p1348_p12, %p1347_p11 }
  0x3e   :  { %v1198_v14 = vld [vmem:[#allocation9 + $0x18] sm:$0xff]   ;;  %v1202_v18 = vld [vmem:[#allocation9 + $0x20] sm:$0xff]   ;;  %v1205_v21 = vld [vmem:[#allocation9 + $0xe8] sm:$0xff]  }
  0x3f   :  { %1082 = vmatpush3.bf16.msra.mxu0 %v1190_v6  ;;  %v1199_v15 = vld [vmem:[#allocation9 + $0x98] sm:$0xff]   ;;  %v1203_v19 = vld [vmem:[#allocation9 + $0xa0] sm:$0xff]   ;;  %v1206_v22 = vld [vmem:[#allocation9 + $0x28] sm:$0xff]   ;;  %v1453_v6 = vand.u32 127, %v796_v1  ;;  %p1350_p0 = pnand %p1349_p13, %p1343_p10 }
  0x40   :  { %1104 = vmatpush3.bf16.msra.mxu1 %v1191_v7  ;;  %1083 = vmatprep.subr.bf16.mxu0 %v1192_v8  ;;  %v1207_v23 = vld [vmem:[#allocation9 + $0xa8] sm:$0xff]   ;;  %v1208_v24 = vld [vmem:[#allocation9 + $0x70] sm:$0xff]   ;;  %v1212_v28 = vld [vmem:[#allocation9 + $0x78] sm:$0xff]  }
  0x41   :  { %1105 = vmatprep.subr.bf16.mxu1 %v1193_v9  ;;  %v1209_v25 = vld [vmem:[#allocation9 + $0xf0] sm:$0xff]   ;;  %v1213_v29 = vld [vmem:[#allocation9 + $0xf8] sm:$0xff]   ;;  %v66_v32 = vld [vmem:[#allocation7] sm:$0xff]  ;;  %vm800_vm0 = vcmp.lt.s32.totalorder %v1453_v6, 32  ;;  %vm861_vm7 = vcmp.eq.s32.totalorder %v1453_v6, 0 }
  0x42   :  { %v1210_v26 = vld [vmem:[#allocation9 + $0x30] sm:$0xff]   ;;  %v1214_v30 = vld [vmem:[#allocation9 + $0x38] sm:$0xff]   ;;  %v70_v33 = vld [vmem:[#allocation7 + $0x20] sm:$0xff] }
  0x43   :  { %1084 = vmatpush3.bf16.msra.mxu0 %v1194_v10  ;;  %v1211_v27 = vld [vmem:[#allocation9 + $0xb0] sm:$0xff]   ;;  %v1215_v31 = vld [vmem:[#allocation9 + $0xb8] sm:$0xff]   ;;  %v67_v34 = vld [vmem:[#allocation7 + $0x8] sm:$0xff]  ;;  %v1006_v35 = vcombine.low %v66_v32, %v70_v33  ;;  %v1007_v36 = vcombine.high %v66_v32, %v70_v33 }
  0x44   :  { %1106 = vmatpush3.bf16.msra.mxu1 %v1195_v11  ;;  %1085 = vmatprep.subr.bf16.mxu0 %v1196_v12  ;;  %v71_v37 = vld [vmem:[#allocation7 + $0x28] sm:$0xff]  ;;  %v1216_v40 = vld [vmem:[#allocation9 + $0x140] sm:$0xff]   ;;  %v1224_v48 = vld [vmem:[#allocation9 + $0x150] sm:$0xff]  }
  0x45   :  { %1107 = vmatprep.subr.bf16.mxu1 %v1197_v13  ;;  %v1008_v38 = vcombine.low %v67_v34, %v71_v37  ;;  %v1009_v39 = vcombine.high %v67_v34, %v71_v37  ;;  %658 = vmatprep.mubr.bf16.mxu0 %v1007_v36  ;;  %v1217_v41 = vld [vmem:[#allocation9 + $0x1c0] sm:$0xff]   ;;  %v1220_v44 = vld [vmem:[#allocation9 + $0x148] sm:$0xff]   ;;  %v1225_v49 = vld [vmem:[#allocation9 + $0x1d0] sm:$0xff]  }
  0x46   :  { %v1218_v42 = vld [vmem:[#allocation9 + $0x100] sm:$0xff]   ;;  %v1221_v45 = vld [vmem:[#allocation9 + $0x1c8] sm:$0xff]   ;;  %v1226_v50 = vld [vmem:[#allocation9 + $0x110] sm:$0xff]  }
  0x47   :  { %1086 = vmatpush3.bf16.msra.mxu0 %v1198_v14  ;;  %699 = vmatprep.mubr.bf16.mxu1 %v1009_v39  ;;  %v1219_v43 = vld [vmem:[#allocation9 + $0x180] sm:$0xff]   ;;  %v1222_v46 = vld [vmem:[#allocation9 + $0x108] sm:$0xff]   ;;  %v1227_v51 = vld [vmem:[#allocation9 + $0x190] sm:$0xff]  }
  0x48   :  { %1108 = vmatpush3.bf16.msra.mxu1 %v1199_v15  ;;  %1087 = vmatprep.subr.bf16.mxu0 %v1200_v16  ;;  %v1223_v47 = vld [vmem:[#allocation9 + $0x188] sm:$0xff]   ;;  %v1228_v52 = vld [vmem:[#allocation9 + $0x158] sm:$0xff]   ;;  %v1232_v56 = vld [vmem:[#allocation9 + $0x160] sm:$0xff]  }
  0x49   :  { %1109 = vmatprep.subr.bf16.mxu1 %v1201_v17  ;;  %v1229_v53 = vld [vmem:[#allocation9 + $0x1d8] sm:$0xff]   ;;  %v1233_v57 = vld [vmem:[#allocation9 + $0x1e0] sm:$0xff]   ;;  %v1236_v60 = vld [vmem:[#allocation9 + $0x168] sm:$0xff]  }
  0x4a   :  { %v1230_v54 = vld [vmem:[#allocation9 + $0x118] sm:$0xff]   ;;  %v1234_v58 = vld [vmem:[#allocation9 + $0x120] sm:$0xff]   ;;  %v1237_v61 = vld [vmem:[#allocation9 + $0x1e8] sm:$0xff]  }
  0x4b   :  { %1088 = vmatpush3.bf16.msra.mxu0 %v1202_v18  ;;  %v1231_v55 = vld [vmem:[#allocation9 + $0x198] sm:$0xff]   ;;  %v1235_v59 = vld [vmem:[#allocation9 + $0x1a0] sm:$0xff]   ;;  %v1238_v62 = vld [vmem:[#allocation9 + $0x128] sm:$0xff]  }
  0x4c   :  { %1110 = vmatpush3.bf16.msra.mxu1 %v1203_v19  ;;  %1089 = vmatprep.subr.bf16.mxu0 %v1204_v20  ;;  %v1239_v63 = vld [vmem:[#allocation9 + $0x1a8] sm:$0xff]   ;;  %v1240_v0 = vld [vmem:[#allocation9 + $0x170] sm:$0xff]   ;;  %v1244_v5 = vld [vmem:[#allocation9 + $0x178] sm:$0xff]  }
  0x4d   :  { %1111 = vmatprep.subr.bf16.mxu1 %v1205_v21  ;;  %v1241_v2 = vld [vmem:[#allocation9 + $0x1f0] sm:$0xff]   ;;  %v1245_v7 = vld [vmem:[#allocation9 + $0x1f8] sm:$0xff]  }
  0x4e   :  { %v1242_v3 = vld [vmem:[#allocation9 + $0x130] sm:$0xff]   ;;  %v1246_v8 = vld [vmem:[#allocation9 + $0x138] sm:$0xff]  }
  0x4f   :  { %1090 = vmatpush3.bf16.msra.mxu0 %v1206_v22  ;;  %v1243_v4 = vld [vmem:[#allocation9 + $0x1b0] sm:$0xff]   ;;  %v1247_v9 = vld [vmem:[#allocation9 + $0x1b8] sm:$0xff]  }
  0x50   :  { %1112 = vmatpush3.bf16.msra.mxu1 %v1207_v23  ;;  %1091 = vmatprep.subr.bf16.mxu0 %v1208_v24  ;;  %v68_v10 = vld [vmem:[#allocation7 + $0x10] sm:$0xff]  ;;  %v69_v14 = vld [vmem:[#allocation7 + $0x18] sm:$0xff]  ;;  %v799_v24 = vld [vmem:[%s1525_s1 + $0x8] sm:$0xff] }
  0x51   :  { %1113 = vmatprep.subr.bf16.mxu1 %v1209_v25  ;;  %v72_v11 = vld [vmem:[#allocation7 + $0x30] sm:$0xff]  ;;  %v73_v15 = vld [vmem:[#allocation7 + $0x38] sm:$0xff]  ;;  %v1465_v25 = vsel %vm800_vm0, %v799_v24, -1e+30 }
  0x52   :  { %v1010_v12 = vcombine.low %v68_v10, %v72_v11  ;;  %v1011_v13 = vcombine.high %v68_v10, %v72_v11  ;;  %v894_v16 = vld [vmem:[#allocation4] sm:$0xff]  ;;  %v1012_v17 = vcombine.low %v69_v14, %v73_v15  ;;  %v1013_v18 = vcombine.high %v69_v14, %v73_v15  ;;  %v895_v20 = vld [vmem:[#allocation4 + $0x8] sm:$0xff] }
  0x53   :  { %1092 = vmatpush3.bf16.msra.mxu0 %v1210_v26  ;;  %v898_v19 = vmul.f32 0.5, %v894_v16  ;;  %v899_v21 = vmul.f32 0.5, %v895_v20  ;;  %v1379_v11 = vmov 0   ;;  %v1489_v20 = vld [vmem:[%s1524_s0 + $0x8] sm:$0xff] }
  0x54   :  { %1114 = vmatpush3.bf16.msra.mxu1 %v1211_v27  ;;  %1093 = vmatprep.subr.bf16.mxu0 %v1212_v28  ;;  %vm842_vm4 = vcmp.ge.s32.totalorder %v1489_v20, 0 }
  0x55   :  { %1115 = vmatprep.subr.bf16.mxu1 %v1213_v29  ;;  %v903_v22 = vsel %vm800_vm0, %v898_v19, -1e+30  ;;  %v904_v23 = vsel %vm800_vm0, %v899_v21, -1e+30  ;;  %1183 = vset.pattern.permute.xlu1 %v1379_v11  ;;  %v1494_v21 = vld [vmem:[%s1524_s0] sm:$0xff] }
  0x56   :  { %929 = vmax.xlane.f32.xlu1 %v903_v22  ;;  %1182 = vset.pattern.permute.xlu0 %v1379_v11  ;;  %vm841_vm3 = vcmp.ge.s32.totalorder %v1494_v21, 0 }
  0x57   :  { %1094 = vmatpush3.bf16.msra.mxu0 %v1214_v30 }
  0x58   :  { %1116 = vmatpush3.bf16.msra.mxu1 %v1215_v31  ;;  %1123 = vmatprep.subr.bf16.mxu0 %v1216_v40 }
  0x59   :  { %1145 = vmatprep.subr.bf16.mxu1 %v1217_v41 }
  0x5a   :  { %659 = vmatmul.mubr.bf16.vlgmr.msra.gmra.mrb[0].mxu0 %v1006_v35  ;;  %931 = vmax.xlane.f32.xlu1 %v904_v23 }
  0x5b   :  { %700 = vmatmul.mubr.bf16.vlgmr.msra.gmra.mrb[0].mxu1 %v1008_v38  ;;  %1124 = vmatpush3.bf16.msra.mxu0 %v1218_v42 }
  0x5c   :  { %1146 = vmatpush3.bf16.msra.mxu1 %v1219_v43  ;;  %1125 = vmatprep.subr.bf16.mxu0 %v1220_v44 }
  0x5d   :  { %1147 = vmatprep.subr.bf16.mxu1 %v1221_v45  ;;  %740 = vmatprep.mubr.bf16.mxu0 %v1011_v13 }
  0x5e   :  { %781 = vmatprep.mubr.bf16.mxu1 %v1013_v18  ;;  %807 = vmax.xlane.f32.xlu1 %v1465_v25 }
  0x5f   :  { %1126 = vmatpush3.bf16.msra.mxu0 %v1222_v46 }
  0x60   :  { %1148 = vmatpush3.bf16.msra.mxu1 %v1223_v47  ;;  %1127 = vmatprep.subr.bf16.mxu0 %v1224_v48 }
  0x61   :  { %1149 = vmatprep.subr.bf16.mxu1 %v1225_v49 }
  0x63   :  { %1128 = vmatpush3.bf16.msra.mxu0 %v1226_v50 }
  0x64   :  { %1150 = vmatpush3.bf16.msra.mxu1 %v1227_v51  ;;  %1129 = vmatprep.subr.bf16.mxu0 %v1228_v52 }
  0x65   :  { %1151 = vmatprep.subr.bf16.mxu1 %v1229_v53 }
  0x67   :  { %1130 = vmatpush3.bf16.msra.mxu0 %v1230_v54 }
  0x68   :  { %1152 = vmatpush3.bf16.msra.mxu1 %v1231_v55  ;;  %1131 = vmatprep.subr.bf16.mxu0 %v1232_v56 }
  0x69   :  { %1153 = vmatprep.subr.bf16.mxu1 %v1233_v57 }
  0x6b   :  { %1132 = vmatpush3.bf16.msra.mxu0 %v1234_v58 }
  0x6c   :  { %1154 = vmatpush3.bf16.msra.mxu1 %v1235_v59  ;;  %1133 = vmatprep.subr.bf16.mxu0 %v1236_v60  ;;  %v1078_v59 = vld [vmem:[%s1529_s5] ss:$0 sm:$0xff] }
  0x6d   :  { %1155 = vmatprep.subr.bf16.mxu1 %v1237_v61 }
  0x6f   :  { %1134 = vmatpush3.bf16.msra.mxu0 %v1238_v62 }
  0x70   :  { %1156 = vmatpush3.bf16.msra.mxu1 %v1239_v63  ;;  %1135 = vmatprep.subr.bf16.mxu0 %v1240_v0 }
  0x71   :  { %1157 = vmatprep.subr.bf16.mxu1 %v1241_v2 }
  0x73   :  { %1136 = vmatpush3.bf16.msra.mxu0 %v1242_v3 }
  0x74   :  { %1158 = vmatpush3.bf16.msra.mxu1 %v1243_v4  ;;  %1137 = vmatprep.subr.bf16.mxu0 %v1244_v5 }
  0x75   :  { %1159 = vmatprep.subr.bf16.mxu1 %v1245_v7  ;;  %v798_v7 = vld [vmem:[%s1525_s1] sm:$0xff] }
  0x77   :  { %1138 = vmatpush3.bf16.msra.mxu0 %v1246_v8 }
  0x78   :  { %1160 = vmatpush3.bf16.msra.mxu1 %v1247_v9  ;;  %v801_v9 = vsel %vm800_vm0, %v798_v7, -1e+30 }
  0x7a   :  { %741 = vmatmul.mubr.bf16.vlgmr.msra.gmra.mrb[4].mxu0 %v1010_v12 }
  0x7b   :  { %782 = vmatmul.mubr.bf16.vlgmr.msra.gmra.mrb[4].mxu1 %v1012_v17 }
  0xe3   :  { %v930_v26 = vpop.xlane.xlu1 %929 }
  0xe4   :  { %v1471_v54 = vsub.f32 %v903_v22, %v930_v26 }
  0xe6   :  { %v935_v62 = vmul.f32 1.442695, %v1471_v54 }
  0xe7   :  { %v932_v27 = vpop.xlane.xlu1 %931 }
  0xe8   :  { %v1468_v28 = vsub.f32 %v904_v23, %v932_v27 }
  0xea   :  { %v937_v29 = vmul.f32 1.442695, %v1468_v28 }
  0xeb   :  { %v1498_v22 = vpop.xlane.xlu1 %807 }
  0xec   :  { %1248 = vpow2.f32 %v937_v29  ;;  %v810_v23 = vsub.f32 %v1465_v25, %v1498_v22 }
  0xed   :  { %1250 = vpow2.f32 %v935_v62 }
  0xee   :  { %v813_v26 = vmul.f32 1.442695, %v810_v23 }
  0xf6   :  { %v1249_v30 = vpop.eup %1248 }
  0xf7   :  { %941 = vadd.xlane.f32.xlu1 %v1249_v30  ;;  %v1251_v10 = vpop.eup %1250 }
 0x12d   :  { %v1095_v31 = vpop.f32.mrb[0].mxu0 }
 0x12e   :  { %v1117_v32 = vpop.f32.mrb[0].mxu1  ;;  %v1096_v33 = vpop.f32.mrb[1].mxu0 }
 0x12f   :  { %v1097_v34 = vadd.f32 %v1096_v33, %v1095_v31  ;;  %v1118_v35 = vpop.f32.mrb[1].mxu1  ;;  %v1098_v36 = vpop.f32.mrb[2].mxu0 }
 0x130   :  { %v1119_v37 = vadd.f32 %v1118_v35, %v1117_v32  ;;  %v1120_v38 = vpop.f32.mrb[2].mxu1  ;;  %v1099_v39 = vpop.f32.mrb[3].mxu0 }
 0x131   :  { %v1100_v40 = vadd.f32 %v1099_v39, %v1098_v36  ;;  %v1121_v41 = vpop.f32.mrb[3].mxu1 }
 0x132   :  { %v702_v42 = vadd.f32 %v1119_v37, %v1097_v34  ;;  %v1122_v43 = vadd.f32 %v1121_v41, %v1120_v38 }
 0x134   :  { %v705_v44 = vadd.f32 %v1122_v43, %v1100_v40 }
 0x14d   :  { %v1139_v45 = vpop.f32.mrb[4].mxu0 }
 0x14e   :  { %v1161_v46 = vpop.f32.mrb[4].mxu1  ;;  %v1140_v47 = vpop.f32.mrb[5].mxu0 }
 0x14f   :  { %v1141_v48 = vadd.f32 %v1140_v47, %v1139_v45  ;;  %v1162_v49 = vpop.f32.mrb[5].mxu1  ;;  %v1142_v50 = vpop.f32.mrb[6].mxu0 }
 0x150   :  { %v1163_v51 = vadd.f32 %v1162_v49, %v1161_v46  ;;  %v1164_v52 = vpop.f32.mrb[6].mxu1  ;;  %v1143_v53 = vpop.f32.mrb[7].mxu0 }
 0x151   :  { %v743_v55 = vadd.f32 %v1141_v48, %v702_v42  ;;  %v1144_v56 = vadd.f32 %v1143_v53, %v1142_v50  ;;  %v1165_v57 = vpop.f32.mrb[7].mxu1 }
 0x152   :  { %v1166_v58 = vadd.f32 %v1165_v57, %v1164_v52 }
 0x153   :  { %v784_v60 = vadd.f32 %v1163_v51, %v743_v55  ;;  %v746_v61 = vadd.f32 %v1144_v56, %v705_v44 }
 0x155   :  { %v787_v63 = vadd.f32 %v1166_v58, %v746_v61  ;;  %v892_v0 = vadd.f32 %v1078_v59, %v784_v60 }
 0x157   :  { %v896_v2 = vmul.f32 0.5, %v892_v0  ;;  %v893_v3 = vadd.f32 %v1078_v59, %v787_v63 }
 0x159   :  { %v901_v4 = vsel %vm800_vm0, %v896_v2, -1e+30  ;;  %v897_v5 = vmul.f32 0.5, %v893_v3 }
 0x15a   :  { %905 = vmax.xlane.f32.xlu0 %v901_v4 }
 0x15b   :  { %v902_v8 = vsel %vm800_vm0, %v897_v5, -1e+30 }
 0x15e   :  { %907 = vmax.xlane.f32.xlu0 %v902_v8 }
 0x162   :  { %805 = vmax.xlane.f32.xlu0 %v801_v9 }
 0x166   :  { %939 = vadd.xlane.f32.xlu0 %v1251_v10 }
 0x184   :  { %v942_v33 = vpop.xlane.xlu1 %941 }
 0x1e7   :  { %v906_v12 = vpop.xlane.xlu0 %905 }
 0x1e8   :  { %v909_v13 = vsub.f32 %v901_v4, %v906_v12 }
 0x1ea   :  { %v911_v14 = vmul.f32 1.442695, %v909_v13 }
 0x1eb   :  { %v908_v15 = vpop.xlane.xlu0 %907 }
 0x1ec   :  { %1252 = vpow2.f32 %v911_v14  ;;  %v910_v16 = vsub.f32 %v902_v8, %v908_v15 }
 0x1ee   :  { %v913_v17 = vmul.f32 1.442695, %v910_v16 }
 0x1ef   :  { %v806_v24 = vpop.xlane.xlu0 %805 }
 0x1f0   :  { %1254 = vpow2.f32 %v913_v17  ;;  %v809_v27 = vsub.f32 %v801_v9, %v806_v24 }
 0x1f1   :  { %1256 = vpow2.f32 %v813_v26 }
 0x1f2   :  { %v811_v29 = vmul.f32 1.442695, %v809_v27 }
 0x1f3   :  { %v940_v32 = vpop.xlane.xlu0 %939 }
 0x1f4   :  { %1258 = vpow2.f32 %v811_v29 }
 0x1f5   :  { %1260 = vlog2.f32 %v940_v32 }
 0x1f6   :  { %v1253_v18 = vpop.eup %1252  ;;  %1262 = vlog2.f32 %v942_v33 }
 0x1f7   :  { %915 = vadd.xlane.f32.xlu0 %v1253_v18 }
 0x1fa   :  { %v1255_v19 = vpop.eup %1254 }
 0x1fb   :  { %917 = vadd.xlane.f32.xlu1 %v1255_v19  ;;  %v1257_v30 = vpop.eup %1256 }
 0x1fe   :  { %v1259_v31 = vpop.eup %1258 }
 0x1ff   :  { %v1261_v36 = vpop.eup %1260 }
 0x200   :  { %v1263_v40 = vpop.eup %1262  ;;  %v944_v41 = vmul.f32 0.6931472, %v1261_v36  ;;  %v859_v36 = vshrl.u32 %v796_v1, 7 }
 0x201   :  { %v946_v46 = vmul.f32 0.6931472, %v1263_v40 }
 0x202   :  { %v947_v47 = vsub.f32 %v1471_v54, %v944_v41  ;;  %vm860_vm6 = vcmp.eq.s32.totalorder %v859_v36, 0 }
 0x203   :  { %v948_v55 = vsub.f32 %v1468_v28, %v946_v46  ;;  %vm862_vm8 = vmand %vm860_vm6, %vm861_vm7 }
 0x20c   :  { %829 = vperm.xlu1 %1183, %v1489_v20  }
 0x20d   :  { %826 = vperm.xlu0 %1182, %v1494_v21  }
 0x22c   :  { %817 = vadd.xlane.f32.xlu0 %v1257_v30 }
 0x230   :  { %815 = vadd.xlane.f32.xlu1 %v1259_v31 }
 0x284   :  { %v916_v34 = vpop.xlane.xlu0 %915 }
 0x285   :  { %1264 = vlog2.f32 %v916_v34 }
 0x286   :  { %1266 = vrcp.f32 %v916_v34 }
 0x288   :  { %v918_v35 = vpop.xlane.xlu1 %917 }
 0x289   :  { %1268 = vlog2.f32 %v918_v35 }
 0x28a   :  { %1270 = vrcp.f32 %v918_v35 }
 0x28c   :  { %v827_v37 = vpop.permute.xlu0 %826  ;;  %v830_v38 = vpop.permute.xlu1 %829 }
 0x28d   :  { %vm831_vm1 = vcmp.eq.s32.totalorder %v1453_v6, %v827_v37  ;;  %vm832_vm2 = vcmp.eq.s32.totalorder %v1453_v6, %v830_v38 }
 0x28e   :  { %v833_v39 = vsel %vm831_vm1, %v801_v9, 0.0  ;;  %v834_v43 = vsel %vm832_vm2, %v1465_v25, 0.0 }
 0x28f   :  { %835 = vadd.xlane.f32.xlu1 %v833_v39  ;;  %v1265_v42 = vpop.eup %1264 }
 0x290   :  { %v924_v44 = vmul.f32 0.6931472, %v1265_v42  ;;  %v1267_v45 = vpop.eup %1266 }
 0x291   :  { %v921_v51 = vmul.f32 %v1267_v45, %v1253_v18 }
 0x292   :  { %v927_v48 = vsub.f32 %v909_v13, %v924_v44 }
 0x293   :  { %837 = vadd.xlane.f32.xlu1 %v834_v43  ;;  %v1269_v49 = vpop.eup %1268 }
 0x294   :  { %v926_v50 = vmul.f32 0.6931472, %v1269_v49  ;;  %v949_v52 = vsub.f32 %v927_v48, %v947_v47  ;;  %v1271_v53 = vpop.eup %1270 }
 0x295   :  { %v922_v58 = vmul.f32 %v1271_v53, %v1255_v19 }
 0x296   :  { %v951_v56 = vmul.f32 %v949_v52, %v921_v51  ;;  %v928_v57 = vsub.f32 %v910_v16, %v926_v50 }
 0x298   :  { %953 = vadd.xlane.f32.xlu1 %v951_v56  ;;  %v950_v59 = vsub.f32 %v928_v57, %v948_v55 }
 0x29a   :  { %v952_v25 = vmul.f32 %v950_v59, %v922_v58 }
 0x29c   :  { %955 = vadd.xlane.f32.xlu1 %v952_v25 }
 0x2b9   :  { %v818_v61 = vpop.xlane.xlu0 %817 }
 0x2bd   :  { %v816_v60 = vpop.xlane.xlu1 %815 }
 0x2be   :  { %1272 = vlog2.f32 %v816_v60 }
 0x2bf   :  { %1274 = vlog2.f32 %v818_v61 }
 0x2c8   :  { %v1273_v54 = vpop.eup %1272 }
 0x2c9   :  { %v820_v62 = vmul.f32 0.6931472, %v1273_v54  ;;  %v1275_v63 = vpop.eup %1274 }
 0x2ca   :  { %v822_v0 = vmul.f32 0.6931472, %v1275_v63 }
 0x2cb   :  { %v823_v2 = vadd.f32 %v820_v62, %v806_v24 }
 0x2cc   :  { %v824_v28 = vadd.f32 %v822_v0, %v1498_v22 }
 0x31c   :  { %v836_v3 = vpop.xlane.xlu1 %835 }
 0x31d   :  { %v839_v4 = vsub.f32 %v823_v2, %v836_v3 }
 0x31f   :  { %v843_v7 = vsel %vm841_vm3, %v839_v4, 0.0 }
 0x320   :  { %v838_v5 = vpop.xlane.xlu1 %837  ;;  %v846_v10 = vsel %vm845_vm5, %v843_v7, 0.0 }
 0x321   :  { %v840_v8 = vsub.f32 %v824_v28, %v838_v5 }
 0x323   :  { %v844_v9 = vsel %vm842_vm4, %v840_v8, 0.0 }
 0x324   :  { %v847_v11 = vsel %vm845_vm5, %v844_v9, 0.0 }
 0x325   :  { %v848_v12 = vadd.f32 %v847_v11, %v846_v10  ;;  %v954_v13 = vpop.xlane.xlu1 %953 }
 0x326   :  { %v959_v14 = vsel %vm841_vm3, %v954_v13, 0.0 }
 0x327   :  { %849 = vadd.xlane.f32.xlu1 %v848_v12  ;;  %v962_v17 = vsel %vm845_vm5, %v959_v14, 0.0 }
 0x329   :  { %v956_v15 = vpop.xlane.xlu1 %955 }
 0x32a   :  { %v960_v16 = vsel %vm842_vm4, %v956_v15, 0.0 }
 0x32b   :  { %v963_v18 = vsel %vm845_vm5, %v960_v16, 0.0 }
 0x32c   :  { %v964_v19 = vadd.f32 %v963_v18, %v962_v17 }
 0x32e   :  { %965 = vadd.xlane.f32.xlu1 %v964_v19 }
 0x3b4   :  { %v850_v21 = vpop.xlane.xlu1 %849 }
 0x3b5   :  { %v851_v22 = vrot.slane %v850_v21, 4 }
 0x3b7   :  { %v852_v20 = vadd.f32 %v851_v22, %v850_v21 }
 0x3b9   :  { %v853_v23 = vrot.slane %v852_v20, 2 }
 0x3bb   :  { %v854_v24 = vadd.f32 %v853_v23, %v852_v20  ;;  %v966_v26 = vpop.xlane.xlu1 %965 }
 0x3bc   :  { %v967_v27 = vrot.slane %v966_v26, 4 }
 0x3bd   :  { %v855_v29 = vrot.slane %v854_v24, 1 }
 0x3be   :  { %v968_v30 = vadd.f32 %v967_v27, %v966_v26 }
 0x3bf   :  { %v856_v31 = vadd.f32 %v855_v29, %v854_v24 }
 0x3c0   :  { %v969_v32 = vrot.slane %v968_v30, 2 }
 0x3c1   :  { %1167 = vpush %v856_v31 }
 0x3c2   :  { %v970_v33 = vadd.f32 %v969_v32, %v968_v30 }
 0x3c4   :  { %v971_v34 = vrot.slane %v970_v33, 1 }
 0x3c6   :  { %v972_v35 = vadd.f32 %v971_v34, %v970_v33 }
 0x3c8   :  { %1169 = vpush %v972_v35 }
 0x3f2   :  { %s1168_s0 = spop %1167 }
 0x3f3   :  { %v863_v37 = vstv %s1168_s0 }
 0x3f4   :  { %v864_v38 = vsel %vm862_vm8, %v863_v37, 0.0 }
 0x3f5   :  { %v979_v39 = vmul.f32 0.25, %v864_v38 }
 0x3f9   :  { %s1170_s20 = spop %1169 }
 0x3fa   :  { %s974_s3 = smul.f32 4.0, %s1170_s20 }
 0x3fc   :  { %s977_s21 = smul.f32 0.015625, %s974_s3 }
 0x3fe   :  { %s980_s22 = smul.f32 0.5, %s977_s21 }
 0x400   :  { %v986_v40 = vstv %s980_s22 }
 0x401   :  { %v987_v41 = vsel %vm862_vm8, %v986_v40, 0.0 }
 0x402   :  { %v988_v42 = vadd.f32 %v987_v41, %v979_v39 }
 0x404   :  { %989 = vst [vmem:[#allocation10] sm:$0xff] %v988_v42 }
 0x405   :  { %1353 = shalt.err (!%p1350_p0)
}
 0x406   :  { %s1354_s28 = scalar_lea.hbm %s1530_s6, 128 }
 0x407   :  { %p1355_p1 = scmp.ne.s32.totalorder %s1530_s6, %s1354_s28  ;;  %p1358_p2 = scmp.lt.u32.totalorder %s1354_s28, %s1530_s6 }
 0x409   :  { %p1360_p3 = pnand %p1358_p2, %p1355_p1 }
 0x40b   :  { %1363 = shalt.err (!%p1360_p3)
}
 0x40c   :  { %999 = dma.vmem_to_hbm [thread:$0]  %s997_s24, 128, %s1530_s6, [#allocation6]  }
 0x40d   :  { %1368 = dma.done.wait [#allocation6], 128  }
 0x40e   :  { %1369 = vsyncadd [#allocation6], 4294967168 }
 0x40f   :  { %1003 = vsyncpa [#allocation5], 1 }
 0x410   :  { %1004 = vsyncpa [#allocation8], 1 }
 0x411   :  { %1005 = vsyncpa [#allocation6], 1 }

</bundles_post_ra>
